<compile_context>
chip_gen: v7x
topology: tpu7x:2x2x1
jax: 0.10.0
libtpu: 0.0.40
codegen_flags: <defaults>
</compile_context>

<pallas_src>
import functools

import jax
import jax.numpy as jnp
from jax.experimental import pallas as pl
from jax.experimental.pallas import tpu as pltpu


def _td_linear_kernel(x_ref, w_ref, b_ref, o_ref, *, relu: bool):
    # x_ref: (TILE_N, K), w_ref: (K, M), b_ref: (1, M), o_ref: (TILE_N, M)
    y = jnp.dot(x_ref[...], w_ref[...], preferred_element_type=jnp.float32)
    y = y + b_ref[...]                      # broadcast bias over rows
    if relu:
        y = jnp.maximum(y, 0.0)
    o_ref[...] = y.astype(o_ref.dtype)


def _round_up(x, m):
    return ((x + m - 1) // m) * m


def _linear_pallas(x2d, weight_t, bias2d, *, relu, tile_n=512):
    """y = x2d @ weight_t + bias, optional ReLU, via a row-tiled Pallas kernel."""
    n, k = x2d.shape
    k2, m = weight_t.shape
    assert k == k2, (k, k2)

    # --- Row-tile sizing ------------------------------------------------
    # VMEM budget: 2x double-buffered (TILE_N, K) + (TILE_N, M) f32 tiles
    # plus the resident (K, M) weight + bias.  24 MiB leaves headroom under
    # v7x's 32 MiB default scoped VMEM (plenty on v5e/v6e's 128 MiB).
    bytes_per_row = 2 * (k + m) * 4
    budget = 24 * 1024 * 1024 - (k * m + m) * 4
    if budget > 0:
        max_rows = max(8, (budget // bytes_per_row) // 8 * 8)
        tile_n = min(tile_n, max_rows)

    # TILE_N must be a multiple of 8 (f32 sublane tiling); pad N up to a
    # multiple of TILE_N so every grid step sees a full block.
    n_pad8 = _round_up(max(n, 1), 8)
    tile_n = min(tile_n, n_pad8)
    n_padded = _round_up(n_pad8, tile_n)
    if n_padded != n:
        x2d = jnp.pad(x2d, ((0, n_padded - n), (0, 0)))

    grid = (n_padded // tile_n,)

    cost = pl.CostEstimate(
        flops=2 * n_padded * k * m,
        transcendentals=0,
        bytes_accessed=4 * (n_padded * k + k * m + m + n_padded * m),
    )

    kernel = functools.partial(_td_linear_kernel, relu=relu)

    y = pl.pallas_call(
        kernel,
        out_shape=jax.ShapeDtypeStruct((n_padded, m), x2d.dtype),
        grid_spec=pltpu.PrefetchScalarGridSpec(
            num_scalar_prefetch=0,
            grid=grid,
            in_specs=[
                pl.BlockSpec((tile_n, k), lambda i: (i, 0)),  # pipelined row tile
                pl.BlockSpec((k, m), lambda i: (0, 0)),       # VMEM-resident weight
                pl.BlockSpec((1, m), lambda i: (0, 0)),       # VMEM-resident bias
            ],
            out_specs=pl.BlockSpec((tile_n, m), lambda i: (i, 0)),
        ),
        compiler_params=pltpu.CompilerParams(
            dimension_semantics=("parallel",),  # v7x: shard row tiles over 2 TCs
        ),
        cost_estimate=cost,
    )(x2d, weight_t, bias2d)

    return y[:n] if n_padded != n else y


def time_distributed_linear(x, weight_t, bias, *, batch_first=False,
                            relu_activation=False, tile_n=512):
    """Pallas equivalent of TimeDistributed(nn.Linear(K, M)).

    x:        (..., K)  (1-D / 2-D / 3-D, as in the PyTorch module)
    weight_t: (K, M)    (transpose of PyTorch's (M, K) weight)
    bias:     (M,)
    """
    k, m = weight_t.shape
    bias2d = bias.reshape(1, m)

    if x.ndim <= 2:
        # PyTorch: `return self.module(x)` — no relu / reshape applied.
        x2d = x if x.ndim == 2 else x.reshape(1, k)
        y = _linear_pallas(x2d, weight_t, bias2d, relu=False, tile_n=tile_n)
        return y if x.ndim == 2 else y.reshape(m)

    # x.ndim == 3: (B, T, K) -> (B*T, K)
    x_flat = x.reshape(-1, x.shape[-1])
    y = _linear_pallas(x_flat, weight_t, bias2d, relu=relu_activation,
                       tile_n=tile_n)
    if batch_first:
        y = y.reshape(x.shape[0], -1, m)
    else:
        y = y.reshape(-1, x.shape[1], m)
    return y


if __name__ == "__main__":
    key = jax.random.PRNGKey(0)
    kx, kw, kb = jax.random.split(key, 3)

    B, T, K, M = 2, 8, 32, 32  # batch, seq, in_features, out_features
    x = jax.random.normal(kx, (B, T, K), dtype=jnp.float32)

    # Deterministic nn.Linear-style params: weight (M, K), bias (M,)
    bound = 1.0 / (K ** 0.5)
    weight = jax.random.uniform(kw, (M, K), minval=-bound, maxval=bound,
                                dtype=jnp.float32)
    bias = jax.random.uniform(kb, (M,), minval=-bound, maxval=bound,
                              dtype=jnp.float32)
    weight_t = weight.T  # (K, M) layout for the kernel

    # 3-D path (flatten -> linear -> relu -> batch_first reshape)
    y = time_distributed_linear(x, weight_t, bias,
                                batch_first=True, relu_activation=True)
    y = jax.block_until_ready(y)
    ref = jnp.maximum(x.reshape(-1, K) @ weight_t + bias, 0.0).reshape(B, -1, M)
    assert y.shape == (B, T, M)
    assert jnp.allclose(y, ref, atol=1e-5, rtol=1e-5)

    # 2-D path (module(x) only: no relu, no reshape)
    x2d = x[0]  # (T, K)
    y2 = jax.block_until_ready(
        time_distributed_linear(x2d, weight_t, bias,
                                batch_first=True, relu_activation=True))
    ref2 = x2d @ weight_t + bias
    assert y2.shape == (T, M)
    assert jnp.allclose(y2, ref2, atol=1e-5, rtol=1e-5)

    print("KERNEL_OK")
</pallas_src>

<mosaic_0001>
module attributes {stable_mosaic.version = 11 : i64} {
  func.func @_td_linear_kernel(%arg0: i32, %arg1: memref<16x32xf32, #tpu.memory_space<vmem>>, %arg2: memref<32x32xf32, #tpu.memory_space<vmem>>, %arg3: memref<1x32xf32, #tpu.memory_space<vmem>>, %arg4: memref<16x32xf32, #tpu.memory_space<vmem>>) attributes {dimension_semantics = [#tpu.dimension_semantics<parallel>], iteration_bounds = array<i64: 1>, scalar_prefetch = 0 : i64, scratch_operands = 0 : i64, tpu.core_type = #tpu.core_type<tc>, window_params = [{transform_indices = @transform_0, window_bounds = array<i64: 16, 32>}, {pipeline_mode = #tpu.pipeline_mode<synchronous>, transform_indices = @transform_1, window_bounds = array<i64: 32, 32>}, {pipeline_mode = #tpu.pipeline_mode<synchronous>, transform_indices = @transform_2, window_bounds = array<i64: 1, 32>}, {transform_indices = @transform_3, window_bounds = array<i64: 16, 32>}]} {
    %c0 = arith.constant 0 : index
    %c0_0 = arith.constant 0 : index
    %0 = vector.load %arg1[%c0, %c0_0] : memref<16x32xf32, #tpu.memory_space<vmem>>, vector<16x32xf32>
    %c0_1 = arith.constant 0 : index
    %c0_2 = arith.constant 0 : index
    %1 = vector.load %arg2[%c0_1, %c0_2] : memref<32x32xf32, #tpu.memory_space<vmem>>, vector<32x32xf32>
    %cst = arith.constant dense<0.000000e+00> : vector<16x32xf32>
    %2 = tpu.matmul %0, %1, %cst {dimension_numbers = #tpu.dot_dimension_numbers<[1], [0], [0], [1], [0, 0, 1, 1], [], []>} : vector<16x32xf32>, vector<32x32xf32>, vector<16x32xf32> -> vector<16x32xf32>
    %c0_3 = arith.constant 0 : index
    %c0_4 = arith.constant 0 : index
    %3 = vector.load %arg3[%c0_3, %c0_4] : memref<1x32xf32, #tpu.memory_space<vmem>>, vector<1x32xf32>
    %4 = vector.broadcast %3 : vector<1x32xf32> to vector<16x32xf32>
    %5 = arith.addf %2, %4 : vector<16x32xf32>
    %cst_5 = arith.constant 0.000000e+00 : f32
    %6 = vector.broadcast %cst_5 : f32 to vector<16x32xf32>
    %7 = arith.maximumf %5, %6 : vector<16x32xf32>
    %c0_6 = arith.constant 0 : index
    %c0_7 = arith.constant 0 : index
    %8 = vector.load %arg4[%c0_6, %c0_7] : memref<16x32xf32, #tpu.memory_space<vmem>>, vector<16x32xf32>
    tpu.vector_store %arg4[%c0_6, %c0_7], %7 {strides = array<i32>} : memref<16x32xf32, #tpu.memory_space<vmem>>, vector<16x32xf32>,
    return
  }
  func.func @transform_0(%arg0: i32) -> (i32, i32) {
    %c0_i32 = arith.constant 0 : i32
    %c0_i32_0 = arith.constant 0 : i32
    return %arg0, %c0_i32 : i32, i32
  }
  func.func @transform_1(%arg0: i32) -> (i32, i32) {
    %c0_i32 = arith.constant 0 : i32
    %c0_i32_0 = arith.constant 0 : i32
    %c0_i32_1 = arith.constant 0 : i32
    return %c0_i32, %c0_i32_0 : i32, i32
  }
  func.func @transform_2(%arg0: i32) -> (i32, i32) {
    %c0_i32 = arith.constant 0 : i32
    %c0_i32_0 = arith.constant 0 : i32
    %c0_i32_1 = arith.constant 0 : i32
    return %c0_i32, %c0_i32_0 : i32, i32
  }
  func.func @transform_3(%arg0: i32) -> (i32, i32) {
    %c0_i32 = arith.constant 0 : i32
    %c0_i32_0 = arith.constant 0 : i32
    return %arg0, %c0_i32 : i32, i32
  }
}

</mosaic_0001>

<bundles_post_ra>
// kernel: tpu_custom_call.1
= control target key start
LH: loop header
LB: loop body
LE: loop exit
PB: predicated region body
PF: predicated region fallthrough
CT: control target
= control target key end

     0   :  { %8 = vsyncpa [#allocation3], 0  ;;  %s342_s0 = inlined_call_operand.hbm [shape: f32[16,32], index: 0, kind: input, shape index: {}]   ;;  %s343_s1 = inlined_call_operand.hbm [shape: f32[32,32], index: 1, kind: input, shape index: {}]   ;;  %s344_s2 = inlined_call_operand.vmem [shape: f32[1,32], index: 2, kind: input, shape index: {}]   ;;  %s345_s3 = inlined_call_operand.hbm [shape: f32[16,32], index: 3, kind: output, shape index: {}]  }
   0x1   :  { %9 = vsyncpa [#allocation6], 0 }
   0x2   :  { %10 = vsyncpa [#allocation4], 0  ;;  %s265_s12 = smov [#allocation2]   ;;  %s193_s16 = scalar_lea.hbm %s342_s0, 256 }
   0x3   :  { %s16_s13 = sshll.u32 %s265_s12, 4  ;;  %p194_p0 = scmp.ne.s32.totalorder %s342_s0, %s193_s16  ;;  %s17_s13 = int_to_ptr.vmem [resolvable:$true] %s16_s13 }
   0x4   :  { %p197_p1 = scmp.lt.u32.totalorder %s193_s16, %s342_s0 }
   0x6   :  { %p199_p2 = pnand %p197_p1, %p194_p0 }
   0x8   :  { %202 = shalt.err (!%p199_p2)
}
   0x9   :  { %s203_s21 = scalar_lea.vmem %s17_s13, 256  ;;  %p208_p4 = scmp.lt.s32.totalorder %s17_s13, %s17_s13 }
   0xa   :  { %p204_p3 = scmp.ne.s32.totalorder %s17_s13, %s203_s21  ;;  %p209_p5 = scmp.lt.s32.totalorder %s203_s21, %s203_s21 }
   0xc   :  { %p210_p6 = por %p209_p5, %p208_p4 }
   0xe   :  { %p211_p7 = pnand %p210_p6, %p204_p3 }
  0x10   :  { %214 = shalt.err (!%p211_p7)
}
  0x11   :  { %s266_s22 = smov 128   ;;  %s267_s23 = smov 8  }
  0x12   :  { %22 = dma.hbm_to_vmem [thread:$0]  %s342_s0, 256, %s17_s13, [#allocation3], %s266_s22, %s266_s22, %s267_s23  }
  0x13   :  { %s268_s26 = smov [#allocation5]   ;;  %s215_s30 = scalar_lea.hbm %s343_s1, 512 }
  0x14   :  { %s28_s27 = sshll.u32 %s268_s26, 4  ;;  %p216_p8 = scmp.ne.s32.totalorder %s343_s1, %s215_s30  ;;  %s29_s27 = int_to_ptr.vmem [resolvable:$true] %s28_s27 }
  0x15   :  { %p219_p9 = scmp.lt.u32.totalorder %s215_s30, %s343_s1 }
  0x17   :  { %p221_p10 = pnand %p219_p9, %p216_p8 }
  0x19   :  { %224 = shalt.err (!%p221_p10)
}
  0x1a   :  { %s225_s8 = scalar_lea.vmem %s29_s27, 512  ;;  %p230_p12 = scmp.lt.s32.totalorder %s29_s27, %s29_s27 }
  0x1b   :  { %p226_p11 = scmp.ne.s32.totalorder %s29_s27, %s225_s8  ;;  %p231_p13 = scmp.lt.s32.totalorder %s225_s8, %s225_s8 }
  0x1d   :  { %p232_p0 = por %p231_p13, %p230_p12 }
  0x1f   :  { %p233_p1 = pnand %p232_p0, %p226_p11 }
  0x21   :  { %236 = shalt.err (!%p233_p1)
}
  0x22   :  { %34 = dma.hbm_to_vmem [thread:$0]  %s343_s1, 512, %s29_s27, [#allocation6], %s266_s22, %s266_s22, %s267_s23  }
  0x23   :  { %259 = dma.done.wait [#allocation3], 256  }
  0x24   :  { %260 = vsyncadd [#allocation3], 4294967040 }
  0x25   :  { %261 = dma.done.wait [#allocation6], 512  }
  0x26   :  { %262 = vsyncadd [#allocation6], 4294966784  ;;  %vm56_vm0 = vcmask 261120   ;;  %v45_v0 = vld [vmem:[#allocation5] sm:$0xff]  ;;  %v46_v1 = vld [vmem:[#allocation5 + $0x8] sm:$0xff]  ;;  %s269_s11 = smov [#allocation7]  }
  0x27   :  { %v47_v2 = vld [vmem:[#allocation5 + $0x10] sm:$0xff]  ;;  %v180_v3 = vpack.c.bf16 %v46_v1, %v45_v0  ;;  %v48_v4 = vld [vmem:[#allocation5 + $0x18] sm:$0xff]  ;;  %s147_s12 = sshll.u32 %s269_s11, 4  ;;  %s148_s12 = int_to_ptr.vmem [resolvable:$true] %s147_s12 }
  0x28   :  { %v43_v5 = vld [vmem:[#allocation2] sm:$0xff]  ;;  %v184_v6 = vpack.c.bf16 %v48_v4, %v47_v2  ;;  %v44_v7 = vld [vmem:[#allocation2 + $0x8] sm:$0xff]  ;;  %s237_s13 = scalar_lea.vmem %s148_s12, 256  ;;  %p242_p3 = scmp.lt.s32.totalorder %s148_s12, %s148_s12 }
  0x29   :  { %177 = vmatprep.mubr.msk.f32.mxu0 %vm56_vm0, %v43_v5  ;;  %181 = vmatprep.subr.bf16.mxu0 %v180_v3  ;;  %v160_v8 = vld [vmem:[%s344_s2] ss:$0 sm:$0xff]  ;;  %p238_p2 = scmp.ne.s32.totalorder %s148_s12, %s237_s13  ;;  %p243_p4 = scmp.lt.s32.totalorder %s237_s13, %s237_s13 }
  0x2a   :  { %183 = vmatpush3.bf16.msra.mxu0 %v180_v3 }
  0x2b   :  { %185 = vmatprep.subr.bf16.mxu0 %v184_v6  ;;  %p244_p5 = por %p243_p4, %p242_p3 }
  0x2d   :  { %p245_p6 = pnand %p244_p5, %p238_p2 }
  0x2e   :  { %187 = vmatpush3.bf16.msra.mxu0 %v184_v6 }
  0x31   :  { %178 = vmatmul.mubr.msk.f32.vlgmr.msra.gmra.mrb[0].mxu0 %vm56_vm0, %v44_v7 }
 0x104   :  { %v179_v9 = vpop.f32.mrb[0].mxu0 }
 0x105   :  { %v135_v10 = vadd.f32 %v179_v9, %v160_v8  ;;  %v129_v11 = vpop.f32.mrb[1].mxu0 }
 0x106   :  { %v130_v12 = vadd.f32 %v160_v8, %v129_v11 }
 0x107   :  { %v139_v13 = vmax.f32 %v135_v10, 0.0 }
 0x108   :  { %v138_v14 = vmax.f32 %v130_v12, 0.0 }
 0x109   :  { %141 = vst.msk [vmem:[#allocation7 + $0x8] sm:$0xff] %vm56_vm0, %v139_v13 }
 0x10a   :  { %140 = vst.msk [vmem:[#allocation7] sm:$0xff] %vm56_vm0, %v138_v14 }
 0x10b   :  { %248 = shalt.err (!%p245_p6)
}
 0x10c   :  { %s249_s15 = scalar_lea.hbm %s345_s3, 256 }
 0x10d   :  { %p250_p7 = scmp.ne.s32.totalorder %s345_s3, %s249_s15  ;;  %p253_p8 = scmp.lt.u32.totalorder %s249_s15, %s345_s3 }
 0x10f   :  { %p255_p9 = pnand %p253_p8, %p250_p7 }
 0x111   :  { %258 = shalt.err (!%p255_p9)
}
 0x112   :  { %153 = dma.vmem_to_hbm [thread:$0]  %s148_s12, 256, %s345_s3, [#allocation4], %s266_s22, %s266_s22, %s267_s23  }
 0x113   :  { %263 = dma.done.wait [#allocation4], 256  }
 0x114   :  { %264 = vsyncadd [#allocation4], 4294967040 }
 0x115   :  { %157 = vsyncpa [#allocation3], 1 }
 0x116   :  { %158 = vsyncpa [#allocation6], 1 }
 0x117   :  { %159 = vsyncpa [#allocation4], 1 }

</bundles_post_ra>
